<compile_context>
chip_gen: v7x
topology: tpu7x:2x2x1
jax: 0.10.0
libtpu: 0.0.40
codegen_flags: <defaults>
</compile_context>

<pallas_src>
import functools

import jax
import jax.numpy as jnp
from jax import lax
from jax.experimental import pallas as pl
from jax.experimental.pallas import tpu as pltpu


def _leaky_relu(x, slope=0.2):
    return jnp.where(x >= 0, x, slope * x)


def feedforward_kernel(x_ref, w1_ref, wdw_ref, w2_ref, o_ref, *, H, W):
    # x_ref  : (1, C, H*W)  one batch element; channels on sublanes, spatial on lanes
    # w1_ref : (Cm, C)      1x1 conv #1 weight (PyTorch [Cm, C, 1, 1] squeezed+T)
    # wdw_ref: (Cm, 9)      depthwise 3x3 weight, tap index t = ky*3 + kx
    # w2_ref : (C, Cm)      1x1 conv #2 weight
    # o_ref  : (1, C, H*W)
    HW = H * W
    x = x_ref[0]                       # (C, HW)
    w = wdw_ref[...]                   # (Cm, 9) -- read once

    # --- 1x1 conv #1 (channel mix on MXU, lane-dense output) + LeakyReLU ---
    h1 = jnp.dot(w1_ref[...], x, preferred_element_type=jnp.float32)   # (Cm, HW)
    h1 = _leaky_relu(h1)

    # --- depthwise 3x3, stride 1, pad 1 ---
    # Boundary predicates on the flattened lane index (zero padding via masking).
    lane = lax.broadcasted_iota(jnp.int32, (1, HW), 1)
    col = lane % W
    left_ok = col >= 1                 # source col x-1 exists
    right_ok = col < (W - 1)           # source col x+1 exists
    top_ok = lane >= W                 # source row y-1 exists
    bot_ok = lane < (H - 1) * W        # source row y+1 exists

    # Horizontal neighbours (shared by all three kernel rows): 2 XLU rolls + 2 selects.
    h_left = jnp.where(left_ok, pltpu.roll(h1, 1, axis=1), 0.0)         # in(., x-1)
    h_right = jnp.where(right_ok, pltpu.roll(h1, HW - 1, axis=1), 0.0)  # in(., x+1)

    # Per-kernel-row horizontal combinations (per-channel taps broadcast along lanes).
    g_top = h_left * w[:, 0:1] + h1 * w[:, 1:2] + h_right * w[:, 2:3]   # ky = 0
    g_mid = h_left * w[:, 3:4] + h1 * w[:, 4:5] + h_right * w[:, 5:6]   # ky = 1
    g_bot = h_left * w[:, 6:7] + h1 * w[:, 7:8] + h_right * w[:, 8:9]   # ky = 2

    # Vertical gather: 2 XLU rolls + 2 selects.
    acc = g_mid
    acc = acc + jnp.where(top_ok, pltpu.roll(g_top, W, axis=1), 0.0)       # row y-1
    acc = acc + jnp.where(bot_ok, pltpu.roll(g_bot, HW - W, axis=1), 0.0)  # row y+1
    h2 = _leaky_relu(acc)

    # --- 1x1 conv #2 back to C channels (lane-dense output store) ---
    out = jnp.dot(w2_ref[...], h2, preferred_element_type=jnp.float32)  # (C, HW)
    o_ref[0] = out.astype(o_ref.dtype)


def feedforward_pallas(x, w1, wdw, w2):
    """x: (B, H, W, C) NHWC; w1: (C, Cm); wdw: (3, 3, Cm); w2: (Cm, C)."""
    B, H, W, C = x.shape
    Cm = w1.shape[1]
    HW = H * W

    # Layout plumbing in plain JAX (outside the kernel): lane-dense (B, C, H*W).
    x_cs = jnp.transpose(x, (0, 3, 1, 2)).reshape(B, C, HW)
    w1t = jnp.transpose(w1)                     # (Cm, C)
    wdw_k = jnp.transpose(wdw.reshape(9, Cm))   # (Cm, 9), tap = ky*3 + kx
    w2t = jnp.transpose(w2)                     # (C, Cm)

    kernel = functools.partial(feedforward_kernel, H=H, W=W)
    out_cs = pl.pallas_call(
        kernel,
        out_shape=jax.ShapeDtypeStruct((B, C, HW), x.dtype),
        grid_spec=pltpu.PrefetchScalarGridSpec(
            num_scalar_prefetch=0,
            grid=(B,),
            in_specs=[
                pl.BlockSpec((1, C, HW), lambda b: (b, 0, 0)),
                pl.BlockSpec((Cm, C), lambda b: (0, 0)),
                pl.BlockSpec((Cm, 9), lambda b: (0, 0)),
                pl.BlockSpec((C, Cm), lambda b: (0, 0)),
            ],
            out_specs=pl.BlockSpec((1, C, HW), lambda b: (b, 0, 0)),
        ),
        compiler_params=pltpu.CompilerParams(
            dimension_semantics=("parallel",),
            vmem_limit_bytes=32 * 1024 * 1024,
        ),
    )(x_cs, w1t, wdw_k, w2t)
    return jnp.transpose(out_cs.reshape(B, C, H, W), (0, 2, 3, 1))


def feedforward_reference(x, w1, wdw, w2):
    """Pure-JAX reference (NHWC) matching the PyTorch module semantics."""
    dn = lax.conv_dimension_numbers(x.shape, (1, 1, 1, 1), ("NHWC", "HWIO", "NHWC"))
    Cm = w1.shape[1]
    h1 = lax.conv_general_dilated(x, w1.reshape(1, 1, *w1.shape),
                                  (1, 1), "VALID", dimension_numbers=dn)
    h1 = jnp.where(h1 >= 0, h1, 0.2 * h1)
    dn3 = lax.conv_dimension_numbers(h1.shape, (3, 3, 1, Cm), ("NHWC", "HWIO", "NHWC"))
    h2 = lax.conv_general_dilated(h1, wdw[:, :, None, :],
                                  (1, 1), ((1, 1), (1, 1)),
                                  dimension_numbers=dn3,
                                  feature_group_count=Cm)
    h2 = jnp.where(h2 >= 0, h2, 0.2 * h2)
    out = lax.conv_general_dilated(h2, w2.reshape(1, 1, *w2.shape),
                                   (1, 1), "VALID", dimension_numbers=dn)
    return out


if __name__ == "__main__":
    # Small shapes: batch=2, spatial=16x16, dim=4, mult=4 -> hidden=16
    B, H, W, C, MULT = 2, 16, 16, 4, 4
    Cm = C * MULT

    key = jax.random.PRNGKey(0)
    kx, k1, k2, k3 = jax.random.split(key, 4)

    x = jax.random.normal(kx, (B, H, W, C), dtype=jnp.float32)
    # Weights correspond to the PyTorch conv weights re-laid-out:
    #   nn.Conv2d(dim, dim*mult, 1) weight [Cm, C, 1, 1]  -> w1  [C, Cm]
    #   depthwise Conv2d weight        [Cm, 1, 3, 3]      -> wdw [3, 3, Cm]
    #   nn.Conv2d(dim*mult, dim, 1) weight [C, Cm, 1, 1]  -> w2  [Cm, C]
    w1 = jax.random.normal(k1, (C, Cm), dtype=jnp.float32) * 0.1
    wdw = jax.random.normal(k2, (3, 3, Cm), dtype=jnp.float32) * 0.1
    w2 = jax.random.normal(k3, (Cm, C), dtype=jnp.float32) * 0.1

    out = jax.jit(feedforward_pallas)(x, w1, wdw, w2)
    jax.block_until_ready(out)

    ref = feedforward_reference(x, w1, wdw, w2)
    jax.block_until_ready(ref)

    assert out.shape == (B, H, W, C)
    assert jnp.allclose(out, ref, atol=1e-4, rtol=1e-4), "mismatch vs reference"

    print("KERNEL_OK")
</pallas_src>

<mosaic_0001>
module attributes {stable_mosaic.version = 11 : i64} {
  func.func @feedforward_kernel(%arg0: i32, %arg1: memref<1x4x256xf32, #tpu.memory_space<vmem>>, %arg2: memref<16x4xf32, #tpu.memory_space<vmem>>, %arg3: memref<16x9xf32, #tpu.memory_space<vmem>>, %arg4: memref<4x16xf32, #tpu.memory_space<vmem>>, %arg5: memref<1x4x256xf32, #tpu.memory_space<vmem>>) attributes {dimension_semantics = [#tpu.dimension_semantics<parallel>], iteration_bounds = array<i64: 2>, scalar_prefetch = 0 : i64, scratch_operands = 0 : i64, tpu.core_type = #tpu.core_type<tc>, window_params = [{transform_indices = @transform_0, window_bounds = array<i64: 1, 4, 256>}, {pipeline_mode = #tpu.pipeline_mode<synchronous>, transform_indices = @transform_1, window_bounds = array<i64: 16, 4>}, {pipeline_mode = #tpu.pipeline_mode<synchronous>, transform_indices = @transform_2, window_bounds = array<i64: 16, 9>}, {pipeline_mode = #tpu.pipeline_mode<synchronous>, transform_indices = @transform_3, window_bounds = array<i64: 4, 16>}, {transform_indices = @transform_4, window_bounds = array<i64: 1, 4, 256>}]} {
    %c0 = arith.constant 0 : index
    %c0_0 = arith.constant 0 : index
    %c0_1 = arith.constant 0 : index
    %0 = vector.load %arg1[%c0, %c0_0, %c0_1] : memref<1x4x256xf32, #tpu.memory_space<vmem>>, vector<1x4x256xf32>
    %1 = vector.shape_cast %0 : vector<1x4x256xf32> to vector<4x256xf32>
    %c0_2 = arith.constant 0 : index
    %c0_3 = arith.constant 0 : index
    %2 = vector.load %arg3[%c0_2, %c0_3] : memref<16x9xf32, #tpu.memory_space<vmem>>, vector<16x9xf32>
    %c0_4 = arith.constant 0 : index
    %c0_5 = arith.constant 0 : index
    %3 = vector.load %arg2[%c0_4, %c0_5] : memref<16x4xf32, #tpu.memory_space<vmem>>, vector<16x4xf32>
    %cst = arith.constant dense<0.000000e+00> : vector<16x256xf32>
    %4 = tpu.matmul %3, %1, %cst {dimension_numbers = #tpu.dot_dimension_numbers<[1], [0], [0], [1], [0, 0, 1, 1], [], []>} : vector<16x4xf32>, vector<4x256xf32>, vector<16x256xf32> -> vector<16x256xf32>
    %cst_6 = arith.constant 0.000000e+00 : f32
    %5 = vector.broadcast %cst_6 : f32 to vector<16x256xf32>
    %6 = arith.cmpf oge, %4, %5 : vector<16x256xf32>
    %cst_7 = arith.constant 2.000000e-01 : f32
    %7 = vector.broadcast %cst_7 : f32 to vector<16x256xf32>
    %8 = arith.mulf %7, %4 : vector<16x256xf32>
    %9 = arith.select %6, %4, %8 : vector<16x256xi1>, vector<16x256xf32>
    %10 = tpu.iota {dimensions = array<i32: 1>} : vector<1x256xi32>
    %c16_i32 = arith.constant 16 : i32
    %c0_i32 = arith.constant 0 : i32
    %11 = arith.cmpi eq, %c16_i32, %c0_i32 : i32
    %c1_i32 = arith.constant 1 : i32
    %12 = arith.select %11, %c1_i32, %c16_i32 : i32
    %13 = vector.broadcast %12 : i32 to vector<1x256xi32>
    %14 = arith.remsi %10, %13 : vector<1x256xi32>
    %c0_i32_8 = arith.constant 0 : i32
    %15 = vector.broadcast %c0_i32_8 : i32 to vector<1x256xi32>
    %16 = arith.cmpi ne, %14, %15 : vector<1x256xi32>
    %c0_i32_9 = arith.constant 0 : i32
    %17 = vector.broadcast %c0_i32_9 : i32 to vector<1x256xi32>
    %18 = arith.cmpi slt, %14, %17 : vector<1x256xi32>
    %c0_i32_10 = arith.constant 0 : i32
    %19 = arith.cmpi slt, %12, %c0_i32_10 : i32
    %20 = vector.broadcast %19 : i1 to vector<1x256xi1>
    %21 = vector.broadcast %20 : vector<1x256xi1> to vector<1x256xi1>
    %22 = arith.xori %18, %21 : vector<1x256xi1>
    %23 = arith.andi %22, %16 : vector<1x256xi1>
    %24 = vector.broadcast %12 : i32 to vector<1x256xi32>
    %25 = arith.addi %14, %24 : vector<1x256xi32>
    %26 = arith.select %23, %25, %14 : vector<1x256xi1>, vector<1x256xi32>
    %c1_i32_11 = arith.constant 1 : i32
    %27 = vector.broadcast %c1_i32_11 : i32 to vector<1x256xi32>
    %28 = arith.cmpi sge, %26, %27 : vector<1x256xi32>
    %c15_i32 = arith.constant 15 : i32
    %29 = vector.broadcast %c15_i32 : i32 to vector<1x256xi32>
    %30 = arith.cmpi slt, %26, %29 : vector<1x256xi32>
    %c16_i32_12 = arith.constant 16 : i32
    %31 = vector.broadcast %c16_i32_12 : i32 to vector<1x256xi32>
    %32 = arith.cmpi sge, %10, %31 : vector<1x256xi32>
    %c240_i32 = arith.constant 240 : i32
    %33 = vector.broadcast %c240_i32 : i32 to vector<1x256xi32>
    %34 = arith.cmpi slt, %10, %33 : vector<1x256xi32>
    %c1_i32_13 = arith.constant 1 : i32
    %35 = tpu.dynamic_rotate %9 by %c1_i32_13 dim 1 : vector<16x256xf32>, i32 -> vector<16x256xf32>
    %cst_14 = arith.constant 0.000000e+00 : f32
    %36 = vector.shape_cast %28 : vector<1x256xi1> to vector<1x256xi1>
    %37 = vector.broadcast %36 : vector<1x256xi1> to vector<16x256xi1>
    %38 = vector.broadcast %cst_14 : f32 to vector<16x256xf32>
    %39 = arith.select %37, %35, %38 : vector<16x256xi1>, vector<16x256xf32>
    %c255_i32 = arith.constant 255 : i32
    %40 = tpu.dynamic_rotate %9 by %c255_i32 dim 1 : vector<16x256xf32>, i32 -> vector<16x256xf32>
    %cst_15 = arith.constant 0.000000e+00 : f32
    %41 = vector.shape_cast %30 : vector<1x256xi1> to vector<1x256xi1>
    %42 = vector.broadcast %41 : vector<1x256xi1> to vector<16x256xi1>
    %43 = vector.broadcast %cst_15 : f32 to vector<16x256xf32>
    %44 = arith.select %42, %40, %43 : vector<16x256xi1>, vector<16x256xf32>
    %45 = vector.extract_strided_slice %2 {offsets = [0, 0], sizes = [16, 1], strides = [1, 1]} : vector<16x9xf32> to vector<16x1xf32>
    %46 = vector.broadcast %45 : vector<16x1xf32> to vector<16x256xf32>
    %47 = arith.mulf %39, %46 : vector<16x256xf32>
    %48 = vector.extract_strided_slice %2 {offsets = [0, 1], sizes = [16, 1], strides = [1, 1]} : vector<16x9xf32> to vector<16x1xf32>
    %49 = vector.broadcast %48 : vector<16x1xf32> to vector<16x256xf32>
    %50 = arith.mulf %9, %49 : vector<16x256xf32>
    %51 = arith.addf %47, %50 : vector<16x256xf32>
    %52 = vector.extract_strided_slice %2 {offsets = [0, 2], sizes = [16, 1], strides = [1, 1]} : vector<16x9xf32> to vector<16x1xf32>
    %53 = vector.broadcast %52 : vector<16x1xf32> to vector<16x256xf32>
    %54 = arith.mulf %44, %53 : vector<16x256xf32>
    %55 = arith.addf %51, %54 : vector<16x256xf32>
    %56 = vector.extract_strided_slice %2 {offsets = [0, 3], sizes = [16, 1], strides = [1, 1]} : vector<16x9xf32> to vector<16x1xf32>
    %57 = vector.broadcast %56 : vector<16x1xf32> to vector<16x256xf32>
    %58 = arith.mulf %39, %57 : vector<16x256xf32>
    %59 = vector.extract_strided_slice %2 {offsets = [0, 4], sizes = [16, 1], strides = [1, 1]} : vector<16x9xf32> to vector<16x1xf32>
    %60 = vector.broadcast %59 : vector<16x1xf32> to vector<16x256xf32>
    %61 = arith.mulf %9, %60 : vector<16x256xf32>
    %62 = arith.addf %58, %61 : vector<16x256xf32>
    %63 = vector.extract_strided_slice %2 {offsets = [0, 5], sizes = [16, 1], strides = [1, 1]} : vector<16x9xf32> to vector<16x1xf32>
    %64 = vector.broadcast %63 : vector<16x1xf32> to vector<16x256xf32>
    %65 = arith.mulf %44, %64 : vector<16x256xf32>
    %66 = arith.addf %62, %65 : vector<16x256xf32>
    %67 = vector.extract_strided_slice %2 {offsets = [0, 6], sizes = [16, 1], strides = [1, 1]} : vector<16x9xf32> to vector<16x1xf32>
    %68 = vector.broadcast %67 : vector<16x1xf32> to vector<16x256xf32>
    %69 = arith.mulf %39, %68 : vector<16x256xf32>
    %70 = vector.extract_strided_slice %2 {offsets = [0, 7], sizes = [16, 1], strides = [1, 1]} : vector<16x9xf32> to vector<16x1xf32>
    %71 = vector.broadcast %70 : vector<16x1xf32> to vector<16x256xf32>
    %72 = arith.mulf %9, %71 : vector<16x256xf32>
    %73 = arith.addf %69, %72 : vector<16x256xf32>
    %74 = vector.extract_strided_slice %2 {offsets = [0, 8], sizes = [16, 1], strides = [1, 1]} : vector<16x9xf32> to vector<16x1xf32>
    %75 = vector.broadcast %74 : vector<16x1xf32> to vector<16x256xf32>
    %76 = arith.mulf %44, %75 : vector<16x256xf32>
    %77 = arith.addf %73, %76 : vector<16x256xf32>
    %c16_i32_16 = arith.constant 16 : i32
    %78 = tpu.dynamic_rotate %55 by %c16_i32_16 dim 1 : vector<16x256xf32>, i32 -> vector<16x256xf32>
    %cst_17 = arith.constant 0.000000e+00 : f32
    %79 = vector.shape_cast %32 : vector<1x256xi1> to vector<1x256xi1>
    %80 = vector.broadcast %79 : vector<1x256xi1> to vector<16x256xi1>
    %81 = vector.broadcast %cst_17 : f32 to vector<16x256xf32>
    %82 = arith.select %80, %78, %81 : vector<16x256xi1>, vector<16x256xf32>
    %83 = arith.addf %66, %82 : vector<16x256xf32>
    %c240_i32_18 = arith.constant 240 : i32
    %84 = tpu.dynamic_rotate %77 by %c240_i32_18 dim 1 : vector<16x256xf32>, i32 -> vector<16x256xf32>
    %cst_19 = arith.constant 0.000000e+00 : f32
    %85 = vector.shape_cast %34 : vector<1x256xi1> to vector<1x256xi1>
    %86 = vector.broadcast %85 : vector<1x256xi1> to vector<16x256xi1>
    %87 = vector.broadcast %cst_19 : f32 to vector<16x256xf32>
    %88 = arith.select %86, %84, %87 : vector<16x256xi1>, vector<16x256xf32>
    %89 = arith.addf %83, %88 : vector<16x256xf32>
    %cst_20 = arith.constant 0.000000e+00 : f32
    %90 = vector.broadcast %cst_20 : f32 to vector<16x256xf32>
    %91 = arith.cmpf oge, %89, %90 : vector<16x256xf32>
    %cst_21 = arith.constant 2.000000e-01 : f32
    %92 = vector.broadcast %cst_21 : f32 to vector<16x256xf32>
    %93 = arith.mulf %92, %89 : vector<16x256xf32>
    %94 = arith.select %91, %89, %93 : vector<16x256xi1>, vector<16x256xf32>
    %c0_22 = arith.constant 0 : index
    %c0_23 = arith.constant 0 : index
    %95 = vector.load %arg4[%c0_22, %c0_23] : memref<4x16xf32, #tpu.memory_space<vmem>>, vector<4x16xf32>
    %cst_24 = arith.constant dense<0.000000e+00> : vector<4x256xf32>
    %96 = tpu.matmul %95, %94, %cst_24 {dimension_numbers = #tpu.dot_dimension_numbers<[1], [0], [0], [1], [0, 0, 1, 1], [], []>} : vector<4x16xf32>, vector<16x256xf32>, vector<4x256xf32> -> vector<4x256xf32>
    %c0_25 = arith.constant 0 : index
    %c0_26 = arith.constant 0 : index
    %c0_27 = arith.constant 0 : index
    %97 = vector.load %arg5[%c0_25, %c0_26, %c0_27] : memref<1x4x256xf32, #tpu.memory_space<vmem>>, vector<1x4x256xf32>
    %98 = vector.shape_cast %97 : vector<1x4x256xf32> to vector<4x256xf32>
    %99 = vector.shape_cast %96 : vector<4x256xf32> to vector<1x4x256xf32>
    tpu.vector_store %arg5[%c0_25, %c0_26, %c0_27], %99 {strides = array<i32>} : memref<1x4x256xf32, #tpu.memory_space<vmem>>, vector<1x4x256xf32>,
    return
  }
  func.func @transform_0(%arg0: i32) -> (i32, i32, i32) {
    %c0_i32 = arith.constant 0 : i32
    %c0_i32_0 = arith.constant 0 : i32
    %c0_i32_1 = arith.constant 0 : i32
    return %arg0, %c0_i32, %c0_i32_0 : i32, i32, i32
  }
  func.func @transform_1(%arg0: i32) -> (i32, i32) {
    %c0_i32 = arith.constant 0 : i32
    %c0_i32_0 = arith.constant 0 : i32
    %c0_i32_1 = arith.constant 0 : i32
    return %c0_i32, %c0_i32_0 : i32, i32
  }
  func.func @transform_2(%arg0: i32) -> (i32, i32) {
    %c0_i32 = arith.constant 0 : i32
    %c0_i32_0 = arith.constant 0 : i32
    %c0_i32_1 = arith.constant 0 : i32
    return %c0_i32, %c0_i32_0 : i32, i32
  }
  func.func @transform_3(%arg0: i32) -> (i32, i32) {
    %c0_i32 = arith.constant 0 : i32
    %c0_i32_0 = arith.constant 0 : i32
    %c0_i32_1 = arith.constant 0 : i32
    return %c0_i32, %c0_i32_0 : i32, i32
  }
  func.func @transform_4(%arg0: i32) -> (i32, i32, i32) {
    %c0_i32 = arith.constant 0 : i32
    %c0_i32_0 = arith.constant 0 : i32
    %c0_i32_1 = arith.constant 0 : i32
    return %arg0, %c0_i32, %c0_i32_0 : i32, i32, i32
  }
}

</mosaic_0001>

<bundles_post_ra>
// kernel: feedforward_pallas.1
= control target key start
LH: loop header
LB: loop body
LE: loop exit
PB: predicated region body
PF: predicated region fallthrough
CT: control target
= control target key end

     0   :  { %s822_s15 = smov 0   ;;  %s1028_s0 = inlined_call_operand.vmem [shape: f32[2,4,256], index: 0, kind: input, shape index: {}]   ;;  %s1029_s1 = inlined_call_operand.vmem [shape: f32[16,4], index: 1, kind: input, shape index: {}]   ;;  %s1030_s2 = inlined_call_operand.vmem [shape: f32[16,9], index: 2, kind: input, shape index: {}]   ;;  %s1031_s3 = inlined_call_operand.vmem [shape: f32[4,16], index: 3, kind: input, shape index: {}]   ;;  %s1032_s4 = inlined_call_operand.vmem [shape: f32[2,4,256], index: 4, kind: output, shape index: {}]  }
   0x1 LB: > { %s715_s16 = sadd.s32 4294967295, %s781_s15   ;;  %p719_p0 = scmp.ge.s32.totalorder %s781_s15, 1  ;;  %s781_s15 = sphi %s822_s15, %s14_s15  }
   0x2   : > { %p162_p1 = scmp.lt.s32.totalorder %s781_s15, 3 }
   0x4   : > { %p163_p2 = pnand %p719_p0, %p162_p1 }
   0x5   : > { %p188_p3 = scmp.lt.s32.totalorder (!%p163_p2), %s715_s16, 1  ;;  %v783_v0 = vmov (!%p163_p2), 0.0   ;;  %v833_v1 = vld [vmem:[%s1030_s2] sm:$0xff] (!%p163_p2)  ;;  %v784_v2 = vmov (!%p163_p2), 1   ;;  %v785_v3 = vmov (!%p163_p2), 0   ;;  %v843_v4 = vld [vmem:[%s1030_s2 + $0x8] sm:$0xff] (!%p163_p2)  ;;  %v306_v39 = vlaneseq (!%p163_p2) }
   0x6   : > { %166 = sbr.rel (%p163_p2) target bundleno = 729 (0x2d9), region = 36  ;;  %281 = vmatprep.mubr.f32.mxu0 (!%p163_p2), %v783_v0  ;;  %648 = vmatprep.mubr.f32.mxu1 (!%p163_p2), %v783_v0  ;;  %vm212_vm0 = vcmask (!%p163_p2), 1043456   ;;  %v201_v7 = vld [vmem:[%s1029_s1] sm:$0xff] (!%p163_p2)  ;;  %vm205_vm1 = vcmask (!%p163_p2), 31744   ;;  %v786_v8 = vmov (!%p163_p2), 6   ;;  %v202_v9 = vld [vmem:[%s1029_s1 + $0x8] sm:$0xff] (!%p163_p2) }
   0x7   : > { %760 = vset.pattern.permute.xlu1 (!%p163_p2), %v784_v2  ;;  %759 = vset.pattern.permute.xlu0 (!%p163_p2), %v785_v3  ;;  %v787_v10 = vmov (!%p163_p2), 7   ;;  %v788_v11 = vmov (!%p163_p2), 2   ;;  %v789_v12 = vmov (!%p163_p2), 8   ;;  %v790_v13 = vmov (!%p163_p2), 3   ;;  %s791_s29 = smov (!%p163_p2), 1   ;;  %s792_s30 = smov (!%p163_p2), 127  }
   0x8   : > { %398 = vperm.xlu1 (!%p163_p2), %760, %v833_v1   ;;  %385 = vperm.xlu0 (!%p163_p2), %759, %v833_v1   ;;  %v793_v26 = vmov (!%p163_p2), 4   ;;  %v794_v27 = vmov (!%p163_p2), 5   ;;  %v900_v42 = vand.u32 (!%p163_p2), 127, %v306_v39  ;;  %s795_s5 = smov (!%p163_p2), 16   ;;  %s796_s6 = smov (!%p163_p2), 112  }
   0xa   : > { %v903_v45 = vadd.s32 (!%p163_p2), 128, %v900_v42  ;;  %v313_v46 = vand.u32 (!%p163_p2), 15, %v900_v42  ;;  %vm349_vm6 = vcmp.lt.s32.totalorder (!%p163_p2), %v900_v42, 1  ;;  %vm370_vm8 = vcmp.lt.s32.totalorder (!%p163_p2), %v900_v42, 127 }
   0xb   : > { %vm525_vm12 = vcmp.lt.s32.totalorder (!%p163_p2), %v900_v42, 16  ;;  %vm337_vm13 = vcmp.ge.s32.totalorder (!%p163_p2), %v900_v42, 16  ;;  %vm550_vm14 = vcmp.lt.s32.totalorder (!%p163_p2), %v900_v42, 112 }
   0xc   : > { %402 = vperm.xlu1 (!%p163_p2), %760, %v843_v4   ;;  %390 = vperm.xlu0 (!%p163_p2), %759, %v843_v4   ;;  %v320_v47 = vand.u32 (!%p163_p2), 15, %v903_v45  ;;  %vm908_vm7 = vcmp.ge.s32.totalorder (!%p163_p2), %v313_v46, 1  ;;  %vm919_vm9 = vcmp.lt.s32.totalorder (!%p163_p2), %v313_v46, 15  ;;  %vm340_vm15 = vcmp.lt.s32.totalorder (!%p163_p2), %v903_v45, 240 }
   0xd   : > { %s1040_s16 = smov (!%p188_p3, %s715_s16), 1 }
   0xe   : > { %s731_s19 = sshll.u32 %s1040_s16, 3  ;;  %vm334_vm10 = vcmp.ge.s32.totalorder %v320_v47, 1  ;;  %vm925_vm11 = vcmp.lt.s32.totalorder %v320_v47, 15 }
   0xf   : > { %s192_s24 = scalar_lea.vmem %s1028_s0, %s731_s19  ;;  %s197_s11 = scalar_lea.vmem %s1032_s4, %s731_s19 }
  0x10   : > { %v198_v5 = vld [vmem:[%s192_s24] sm:$0xff]  ;;  %762 = vset.pattern.permute.xlu1 %v786_v8  ;;  %761 = vset.pattern.permute.xlu0 %v786_v8 }
  0x11   : > { %v204_v6 = vcombine.high %v198_v5, %v198_v5  ;;  %478 = vperm.xlu1 %762, %v843_v4   ;;  %474 = vperm.xlu0 %761, %v833_v1  }
  0x13   : > { %724 = vmatprep.subr.msk.mxu0 %vm212_vm0, %v204_v6 }
  0x14   : > { %725 = vmatpush1.msk.msra.mxu0 %vm212_vm0, %v198_v5 }
  0x15   : > { %726 = vmatmul.mubr.msk.f32.vlgmr.msra.gmra.mrb[0].mxu0 %vm205_vm1, %v201_v7  ;;  %763 = vset.pattern.permute.xlu1 %v787_v10 }
  0x16   : > { %287 = vmatprep.mubr.f32.mxu0 %v783_v0  ;;  %486 = vperm.xlu1 %763, %v833_v1  }
  0x17   : > { %764 = vset.pattern.permute.xlu0 %v787_v10 }
  0x18   : > { %490 = vperm.xlu0 %764, %v843_v4  }
  0x19   : > { %727 = vmatmul.mubr.msk.f32.gmra.mrb[2].mxu0 %vm205_vm1, %v202_v9 }
  0x1a   : > { %765 = vset.pattern.permute.xlu1 %v788_v11 }
  0x1b   : > { %414 = vperm.xlu1 %765, %v833_v1  }
  0x1c   : > { %766 = vset.pattern.permute.xlu0 %v789_v12 }
  0x1d   : > { %502 = vperm.xlu0 %766, %v833_v1  }
  0x1f   : > { %418 = vperm.xlu1 %765, %v843_v4  }
  0x21   : > { %769 = vset.pattern.permute.xlu0 %v790_v13 }
  0x23   : > { %767 = vset.pattern.permute.xlu1 %v789_v12 }
  0x24   : > { %506 = vperm.xlu1 %767, %v843_v4  }
  0x28   : > { %768 = vset.pattern.permute.xlu1 %v790_v13 }
  0x87   : > { %v399_v28 = vpop.permute.xlu1 %398  ;;  %v386_v31 = vpop.permute.xlu0 %385 }
  0x8b   : > { %v403_v29 = vpop.permute.xlu1 %402  ;;  %v391_v33 = vpop.permute.xlu0 %390 }
  0x90   : > { %v888_v30 = vpop.permute.xlu1 %478  ;;  %v892_v35 = vpop.permute.xlu0 %474 }
  0x95   : > { %v890_v32 = vpop.permute.xlu1 %486 }
  0x97   : > { %v894_v37 = vpop.permute.xlu0 %490 }
  0x9a   : > { %v415_v34 = vpop.permute.xlu1 %414 }
  0x9c   : > { %v898_v40 = vpop.permute.xlu0 %502 }
  0x9e   : > { %v419_v36 = vpop.permute.xlu1 %418 }
  0xa3   : > { %v896_v38 = vpop.permute.xlu1 %506 }
  0xe8   : > { %v283_v14 = vpop.f32.mrb[0].mxu0 }
  0xe9   : > { %vm294_vm2 = vcmp.ge.f32.partialorder %v283_v14, 0.0  ;;  %v298_v15 = vmul.f32 0.2, %v283_v14  ;;  %v285_v16 = vpop.f32.mrb[1].mxu0 }
  0xea   : > { %v299_v21 = vmul.f32 0.2, %v285_v16  ;;  %vm295_vm4 = vcmp.ge.f32.partialorder %v285_v16, 0.0 }
  0xeb   : > { %v866_v17 = vsel %vm294_vm2, %v283_v14, %v298_v15 }
  0xec   : > { %341 = vrot.lane.b32.xlu1 %v866_v17, %s791_s29  ;;  %v289_v18 = vpop.f32.mrb[2].mxu0  ;;  %v873_v23 = vsel %vm295_vm4, %v285_v16, %v299_v21  ;;  %v405_v6 = vmul.f32 %v399_v28, %v866_v17  ;;  %vm580_vm4 = vcmask 130048  }
  0xed   : > { %vm296_vm3 = vcmp.ge.f32.partialorder %v289_v18, 0.0  ;;  %v300_v19 = vmul.f32 0.2, %v289_v18  ;;  %v291_v20 = vpop.f32.mrb[3].mxu0  ;;  %v406_v21 = vmul.f32 %v399_v28, %v873_v23 }
  0xee   : > { %v301_v24 = vmul.f32 0.2, %v291_v20  ;;  %vm297_vm5 = vcmp.ge.f32.partialorder %v291_v20, 0.0 }
  0xef   : > { %v869_v22 = vsel %vm296_vm3, %v289_v18, %v300_v19 }
  0xf0   : > { %362 = vrot.lane.b32.xlu1 %v866_v17, %s792_s30  ;;  %343 = vrot.lane.b32.xlu0 %v869_v22, %s791_s29  ;;  %v877_v25 = vsel %vm297_vm5, %v291_v20, %v301_v24  ;;  %v407_v10 = vmul.f32 %v403_v29, %v869_v22 }
  0xf4   : > { %345 = vrot.lane.b32.xlu1 %v873_v23, %s791_s29  ;;  %364 = vrot.lane.b32.xlu0 %v869_v22, %s792_s30 }
  0xf8   : > { %366 = vrot.lane.b32.xlu1 %v873_v23, %s792_s30  ;;  %347 = vrot.lane.b32.xlu0 %v877_v25, %s791_s29 }
  0xfc   : > { %430 = vperm.xlu1 %768, %v833_v1   ;;  %368 = vrot.lane.b32.xlu0 %v877_v25, %s792_s30 }
 0x100   : > { %770 = vset.pattern.permute.xlu1 %v793_v26  ;;  %434 = vperm.xlu0 %769, %v843_v4  }
 0x101   : > { %442 = vperm.xlu1 %770, %v833_v1  }
 0x104   : > { %771 = vset.pattern.permute.xlu0 %v794_v27 }
 0x105   : > { %446 = vperm.xlu1 %770, %v843_v4   ;;  %458 = vperm.xlu0 %771, %v833_v1  }
 0x109   : > { %772 = vset.pattern.permute.xlu1 %v794_v27  ;;  %773 = vset.pattern.permute.xlu0 %v789_v12  ;;  %v408_v27 = vmul.f32 %v403_v29, %v877_v25  ;;  %v495_v29 = vmul.f32 %v894_v37, %v869_v22 }
 0x10a   : > { %462 = vperm.xlu1 %772, %v843_v4  }
 0x15e   : > { %v342_v41 = vpop.permute.xlu1 %341 }
 0x162   : > { %v363_v43 = vpop.permute.xlu1 %362  ;;  %v344_v44 = vpop.permute.xlu0 %343 }
 0x166   : > { %v346_v49 = vpop.permute.xlu1 %345  ;;  %v365_v50 = vpop.permute.xlu0 %364 }
 0x167   : > { %v352_v51 = vsel %vm349_vm6, %v346_v49, %v342_v41  ;;  %v350_v54 = vsel %vm349_vm6, %v342_v41, %v346_v49 }
 0x168   : > { %v917_v52 = vsel %vm908_vm7, %v352_v51, 0.0  ;;  %v946_v1 = vsel %vm334_vm10, %v350_v54, 0.0  ;;  %v496_v54 = vmul.f32 %v894_v37, %v877_v25 }
 0x169   : > { %v393_v61 = vmul.f32 %v386_v31, %v917_v52  ;;  %v394_v11 = vmul.f32 %v386_v31, %v946_v1  ;;  %v481_v31 = vmul.f32 %v892_v35, %v917_v52  ;;  %v482_v46 = vmul.f32 %v892_v35, %v946_v1 }
 0x16a   : > { %v367_v55 = vpop.permute.xlu1 %366  ;;  %v348_v56 = vpop.permute.xlu0 %347 }
 0x16b   : > { %v371_v58 = vsel %vm370_vm8, %v363_v43, %v367_v55  ;;  %v351_v59 = vsel %vm349_vm6, %v344_v44, %v348_v56  ;;  %v353_v60 = vsel %vm349_vm6, %v348_v56, %v344_v44  ;;  %v373_v62 = vsel %vm370_vm8, %v367_v55, %v363_v43 }
 0x16c   : > { %v940_v63 = vsel %vm919_vm9, %v371_v58, 0.0  ;;  %v944_v0 = vsel %vm908_vm7, %v353_v60, 0.0  ;;  %v949_v3 = vsel %vm334_vm10, %v351_v59, 0.0  ;;  %v955_v7 = vsel %vm925_vm11, %v373_v62, 0.0 }
 0x16d   : > { %v421_v2 = vmul.f32 %v415_v34, %v940_v63  ;;  %v395_v4 = vmul.f32 %v391_v33, %v944_v0  ;;  %v409_v14 = vadd.f32 %v405_v6, %v393_v61  ;;  %v396_v15 = vmul.f32 %v391_v33, %v949_v3 }
 0x16e   : > { %v369_v5 = vpop.permute.xlu0 %368  ;;  %v422_v19 = vmul.f32 %v415_v34, %v955_v7  ;;  %v410_v39 = vadd.f32 %v406_v21, %v394_v11  ;;  %v483_v33 = vmul.f32 %v888_v30, %v944_v0  ;;  %v493_v34 = vmul.f32 %v890_v32, %v866_v17 }
 0x16f   : > { %v372_v8 = vsel %vm370_vm8, %v365_v50, %v369_v5  ;;  %v374_v9 = vsel %vm370_vm8, %v369_v5, %v365_v50  ;;  %v411_v18 = vadd.f32 %v407_v10, %v395_v4  ;;  %v425_v20 = vadd.f32 %v421_v2, %v409_v14 }
 0x170   : > { %v965_v12 = vsel %vm919_vm9, %v372_v8, 0.0  ;;  %v969_v13 = vsel %vm925_vm11, %v374_v9, 0.0  ;;  %v412_v41 = vadd.f32 %v408_v27, %v396_v15  ;;  %v509_v28 = vmul.f32 %v898_v40, %v940_v63 }
 0x171   : > { %v423_v16 = vmul.f32 %v419_v36, %v965_v12  ;;  %v424_v24 = vmul.f32 %v419_v36, %v969_v13  ;;  %517 = vrot.lane.b32.xlu1 %v425_v20, %s795_s5  ;;  %v426_v36 = vadd.f32 %v422_v19, %v410_v39  ;;  %v511_v43 = vmul.f32 %v896_v38, %v965_v12 }
 0x172   : > { %v497_v47 = vadd.f32 %v493_v34, %v481_v31  ;;  %v484_v48 = vmul.f32 %v888_v30, %v949_v3  ;;  %v499_v49 = vadd.f32 %v495_v29, %v483_v33  ;;  %v494_v50 = vmul.f32 %v890_v32, %v873_v23 }
 0x173   : > { %v427_v26 = vadd.f32 %v423_v16, %v411_v18  ;;  %v428_v44 = vadd.f32 %v424_v24, %v412_v41  ;;  %v510_v51 = vmul.f32 %v898_v40, %v955_v7  ;;  %v512_v35 = vmul.f32 %v896_v38, %v969_v13 }
 0x174   : > { %v513_v53 = vadd.f32 %v509_v28, %v497_v47  ;;  %v515_v56 = vadd.f32 %v511_v43, %v499_v49  ;;  %v498_v30 = vadd.f32 %v494_v50, %v482_v46  ;;  %v500_v57 = vadd.f32 %v496_v54, %v484_v48 }
 0x175   : > { %519 = vrot.lane.b32.xlu0 %v427_v26, %s795_s5  ;;  %521 = vrot.lane.b32.xlu1 %v426_v36, %s795_s5 }
 0x176   : > { %v514_v58 = vadd.f32 %v510_v51, %v498_v30  ;;  %v516_v32 = vadd.f32 %v512_v35, %v500_v57 }
 0x179   : > { %523 = vrot.lane.b32.xlu0 %v428_v44, %s795_s5  ;;  %542 = vrot.lane.b32.xlu1 %v513_v53, %s796_s6 }
 0x17b   : > { %v431_v55 = vpop.permute.xlu1 %430 }
 0x17c   : > { %v437_v37 = vmul.f32 %v431_v55, %v917_v52  ;;  %v438_v38 = vmul.f32 %v431_v55, %v946_v1 }
 0x17d   : > { %544 = vrot.lane.b32.xlu0 %v515_v56, %s796_s6  ;;  %546 = vrot.lane.b32.xlu1 %v514_v58, %s796_s6 }
 0x17f   : > { %v435_v59 = vpop.permute.xlu0 %434 }
 0x180   : > { %v443_v60 = vpop.permute.xlu1 %442  ;;  %v440_v52 = vmul.f32 %v435_v59, %v949_v3 }
 0x181   : > { %v449_v40 = vmul.f32 %v443_v60, %v866_v17  ;;  %v450_v61 = vmul.f32 %v443_v60, %v873_v23  ;;  %548 = vrot.lane.b32.xlu0 %v516_v32, %s796_s6  ;;  %v439_v23 = vmul.f32 %v435_v59, %v944_v0  ;;  %v579_v59 = vld [vmem:[%s1031_s3] sm:$0xf] }
 0x183   : > { %v453_v4 = vadd.f32 %v449_v40, %v437_v37  ;;  %v454_v5 = vadd.f32 %v450_v61, %v438_v38 }
 0x184   : > { %v447_v62 = vpop.permute.xlu1 %446  ;;  %v459_v2 = vpop.permute.xlu0 %458 }
 0x185   : > { %v465_v6 = vmul.f32 %v459_v2, %v940_v63  ;;  %v466_v8 = vmul.f32 %v459_v2, %v955_v7  ;;  %v451_v9 = vmul.f32 %v447_v62, %v869_v22  ;;  %v452_v10 = vmul.f32 %v447_v62, %v877_v25 }
 0x187   : > { %v469_v17 = vadd.f32 %v465_v6, %v453_v4  ;;  %v470_v11 = vadd.f32 %v466_v8, %v454_v5  ;;  %v455_v1 = vadd.f32 %v451_v9, %v439_v23  ;;  %v456_v15 = vadd.f32 %v452_v10, %v440_v52 }
 0x189   : > { %v463_v14 = vpop.permute.xlu1 %462 }
 0x18a   : > { %v467_v16 = vmul.f32 %v463_v14, %v965_v12  ;;  %v468_v18 = vmul.f32 %v463_v14, %v969_v13 }
 0x18c   : > { %v471_v63 = vadd.f32 %v467_v16, %v455_v1  ;;  %v472_v19 = vadd.f32 %v468_v18, %v456_v15 }
 0x1e3   : > { %v518_v7 = vpop.permute.xlu1 %517 }
 0x1e7   : > { %v520_v20 = vpop.permute.xlu0 %519  ;;  %v522_v22 = vpop.permute.xlu1 %521 }
 0x1e8   : > { %v528_v0 = vsel %vm525_vm12, %v522_v22, %v518_v7  ;;  %v526_v24 = vsel %vm525_vm12, %v518_v7, %v522_v22 }
 0x1e9   : > { %v534_v26 = vsel %vm337_vm13, %v528_v0, 0.0  ;;  %v539_v39 = vadd.f32 %v526_v24, %v470_v11 }
 0x1ea   : > { %v538_v13 = vadd.f32 %v534_v26, %v469_v17 }
 0x1eb   : > { %v524_v25 = vpop.permute.xlu0 %523  ;;  %v543_v3 = vpop.permute.xlu1 %542 }
 0x1ec   : > { %v529_v21 = vsel %vm525_vm12, %v524_v25, %v520_v20  ;;  %v527_v31 = vsel %vm525_vm12, %v520_v20, %v524_v25 }
 0x1ed   : > { %v536_v12 = vsel %vm337_vm13, %v529_v21, 0.0  ;;  %v541_v34 = vadd.f32 %v527_v31, %v472_v19 }
 0x1ee   : > { %v540_v41 = vadd.f32 %v536_v12, %v471_v63 }
 0x1ef   : > { %v545_v27 = vpop.permute.xlu0 %544  ;;  %v547_v33 = vpop.permute.xlu1 %546 }
 0x1f0   : > { %v551_v28 = vsel %vm550_vm14, %v543_v3, %v547_v33  ;;  %v553_v36 = vsel %vm550_vm14, %v547_v33, %v543_v3 }
 0x1f1   : > { %v560_v43 = vsel %vm340_vm15, %v553_v36, 0.0  ;;  %v563_v44 = vadd.f32 %v551_v28, %v538_v13 }
 0x1f2   : > { %v564_v48 = vadd.f32 %v560_v43, %v539_v39 }
 0x1f3   : > { %v549_v29 = vpop.permute.xlu0 %548  ;;  %vm567_vm0 = vcmp.ge.f32.partialorder %v563_v44, 0.0  ;;  %v571_v42 = vmul.f32 0.2, %v563_v44 }
 0x1f4   : > { %v552_v46 = vsel %vm550_vm14, %v545_v27, %v549_v29  ;;  %v554_v47 = vsel %vm550_vm14, %v549_v29, %v545_v27  ;;  %vm568_vm1 = vcmp.ge.f32.partialorder %v564_v48, 0.0  ;;  %v572_v45 = vmul.f32 0.2, %v564_v48 }
 0x1f5   : > { %v562_v49 = vsel %vm340_vm15, %v554_v47, 0.0  ;;  %v565_v50 = vadd.f32 %v552_v46, %v540_v41  ;;  %v575_v35 = vsel %vm567_vm0, %v563_v44, %v571_v42 }
 0x1f6   : > { %v566_v51 = vadd.f32 %v562_v49, %v541_v34  ;;  %v576_v56 = vsel %vm568_vm1, %v564_v48, %v572_v45 }
 0x1f7   : > { %vm569_vm2 = vcmp.ge.f32.partialorder %v565_v50, 0.0  ;;  %v573_v53 = vmul.f32 0.2, %v565_v50 }
 0x1f8   : > { %vm570_vm3 = vcmp.ge.f32.partialorder %v566_v51, 0.0  ;;  %v574_v54 = vmul.f32 0.2, %v566_v51 }
 0x1f9   : > { %v577_v55 = vsel %vm569_vm2, %v565_v50, %v573_v53 }
 0x1fa   : > { %v578_v30 = vsel %vm570_vm3, %v566_v51, %v574_v54  ;;  %v735_v57 = vpack.c.bf16 %v577_v55, %v575_v35 }
 0x1fb   : > { %v733_v58 = vpack.c.bf16 %v578_v30, %v576_v56 }
 0x1fd   : > { %734 = vmatprep.subr.bf16.mxu1 %v733_v58 }
 0x1fe   : > { %736 = vmatpush1.bf16.msra.mxu1 %v735_v57 }
 0x201   : > { %728 = vmatmul.mubr.msk.f32.vlgmr.msra.gmra.mrb[0].mxu1 %vm580_vm4, %v579_v59 }
 0x2d4   : > { %v650_v32 = vpop.f32.mrb[0].mxu1 }
 0x2d5   : > { %v652_v60 = vpop.f32.mrb[1].mxu1 }
 0x2d6   : > { %v657_v40 = vcombine.low %v650_v32, %v652_v60 }
 0x2d8   : > { %659 = vst [vmem:[%s197_s11] sm:$0xff] %v657_v40 }
 0x2d9 PF: > { %s14_s15 = sadd.s32 1, %s781_s15  }
 0x2da   : > { %p11_p4 = scmp.ge.s32.totalorder %s14_s15, 4  }
 0x2dc   :  { %13 = sbr.rel (!%p11_p4) target bundleno = 1 (0x1), region = 66 }

</bundles_post_ra>
